<compile_context>
chip_gen: v5e
topology: v5e:2x2
jax: 0.10.0
libtpu: 0.0.40
codegen_flags: <defaults>
</compile_context>

<pallas_src>
import jax
import jax.numpy as jnp
from jax.experimental import pallas as pl
from jax.experimental.pallas import tpu as pltpu

_EPS = 1e-5  # PyTorch BatchNorm1d default eps

# Row indices inside the packed (8, U//2) per-branch vector slab (rows 6-7 are padding).
_B12, _G1, _BE1, _B34, _G2, _BE2 = range(6)


# ---------------------------------------------------------------------------
# Fused Pallas kernel: both branches statically unrolled, concat-free output.
# ---------------------------------------------------------------------------
def _dskn2_kernel(x_ref, w12_ref, w34_ref, vec_ref, o_ref):
    n = x_ref.shape[0]
    u4 = o_ref.shape[-1]
    inv_n = 1.0 / n                                   # static Python float
    x = x_ref[...]

    def bn_act(v, gamma, beta, act):
        # One-pass training-mode batch stats (biased variance), then BN folded into a
        # single scale/shift fused multiply-add over the tile.
        mean = jnp.sum(v, axis=0, keepdims=True) * inv_n
        ex2 = jnp.sum(v * v, axis=0, keepdims=True) * inv_n
        var = ex2 - mean * mean
        scale = gamma * jax.lax.rsqrt(var + _EPS)     # (1, U') row math, ~free
        shift = beta - mean * scale
        return act(v * scale + shift)

    relu = lambda v: jnp.maximum(v, 0.0)

    # Static unroll: branch 0 = Spec (ReLU), branch 1 = Arc (cos).  Activation choice is
    # static, so the Spec branch never touches the EUP.
    for b, act in ((0, relu), (1, jnp.cos)):
        vec = vec_ref[b]                              # (8, U//2) packed 1-D params
        b12 = vec[_B12:_B12 + 1, :]
        g1 = vec[_G1:_G1 + 1, :]
        be1 = vec[_BE1:_BE1 + 1, :]
        b34 = vec[_B34:_B34 + 1, :u4]
        g2 = vec[_G2:_G2 + 1, :u4]
        be2 = vec[_BE2:_BE2 + 1, :u4]

        # Folded Linear pairs: exactly 2 MXU dots per branch.
        h = jnp.dot(x, w12_ref[b], preferred_element_type=jnp.float32) + b12
        h = bn_act(h, g1, be1, act)
        h = jnp.dot(h, w34_ref[b], preferred_element_type=jnp.float32) + b34
        h = bn_act(h, g2, be2, act)

        # Fused torch.cat(dim=0): static row-slice store into the (2N, U//4) output.
        o_ref[b * n:(b + 1) * n, :] = h.astype(o_ref.dtype)


def dskn2_forward(x, packed):
    """x: (N, U) f32. packed: output of pack_params(). Returns (2N, U//4) f32."""
    n, u = x.shape
    u2, u4 = u // 2, u // 4
    w12, w34, vec = packed                            # (2,U,U//2), (2,U//2,U//4), (2,8,U//2)

    flops = 4 * n * (u * u2 + u2 * u4)                # both branches, 2 folded MACs*2 each
    transcendentals = n * (u2 + u4) + 2 * (u2 + u4)   # Arc-branch cos + BN rsqrt rows
    bytes_accessed = 4 * (x.size + w12.size + w34.size + vec.size + 2 * n * u4)

    vmem = pl.BlockSpec(memory_space=pltpu.MemorySpace.VMEM)
    return pl.pallas_call(
        _dskn2_kernel,
        out_shape=jax.ShapeDtypeStruct((2 * n, u4), jnp.float32),
        in_specs=[vmem, vmem, vmem, vmem],
        out_specs=vmem,
        cost_estimate=pl.CostEstimate(
            flops=flops,
            transcendentals=transcendentals,
            bytes_accessed=bytes_accessed,
        ),
    )(x, w12, w34, vec)


# ---------------------------------------------------------------------------
# One-time host-side parameter packing: transposes, the W2 column slice, the
# Linear-pair folding, and the 1-D parameter packing are all hoisted here.
# ---------------------------------------------------------------------------
def pack_params(spec_p, arc_p):
    u2 = spec_p["w1"].shape[0]

    def one(p):
        w1t = p["w1"].T                               # (U, U//2)
        # w2 declared (U//2, U): only its first U//2 input columns are consumable.
        w2t = p["w2"][:, :u2].T                       # (U//2, U//2)
        w3t = p["w3"].T                               # (U//2, U//4)
        w4t = p["w4"].T                               # (U//4, U//4)

        # Fold adjacent Linear pairs (no nonlinearity in between).
        w12 = w1t @ w2t                               # (U, U//2)
        b12 = p["b1"] @ w2t + p["b2"]                 # (U//2,)
        w34 = w3t @ w4t                               # (U//2, U//4)
        b34 = p["b3"] @ w4t + p["b4"]                 # (U//4,)

        def pad(v):                                   # lift (k,) -> (U//2,), zero-padded
            return jnp.pad(v, (0, u2 - v.shape[0])) if v.shape[0] < u2 else v

        zero = jnp.zeros((u2,), jnp.float32)
        vec = jnp.stack([
            pad(b12), pad(p["g1"]), pad(p["be1"]),
            pad(b34), pad(p["g2"]), pad(p["be2"]),
            zero, zero,                               # pad to 8 rows (sublane-friendly)
        ])                                            # (8, U//2)
        return w12, w34, vec

    s = one(spec_p)
    a = one(arc_p)
    # Stack Spec (branch 0) and Arc (branch 1) along a leading axis.
    return tuple(jnp.stack([si, ai]) for si, ai in zip(s, a))


# ---------------------------------------------------------------------------
# Deterministic parameter init (PyTorch Linear-style uniform; BN gamma=1, beta=0)
# ---------------------------------------------------------------------------
def init_branch_params(key, units):
    u, u2, u4 = units, units // 2, units // 4
    ks = jax.random.split(key, 4)

    def lin(k, out_f, in_f):
        bound = 1.0 / (in_f ** 0.5)
        kw, kb = jax.random.split(k)
        w = jax.random.uniform(kw, (out_f, in_f), jnp.float32, -bound, bound)
        b = jax.random.uniform(kb, (out_f,), jnp.float32, -bound, bound)
        return w, b

    w1, b1 = lin(ks[0], u2, u)    # nn.Linear(U, U//2)
    w2, b2 = lin(ks[1], u2, u)    # nn.Linear(U, U//2)  (declared shape; see TODO)
    w3, b3 = lin(ks[2], u4, u2)   # nn.Linear(U//2, U//4)
    w4, b4 = lin(ks[3], u4, u4)   # nn.Linear(U//4, U//4)
    return dict(
        w1=w1, b1=b1, w2=w2, b2=b2,
        g1=jnp.ones((u2,), jnp.float32), be1=jnp.zeros((u2,), jnp.float32),
        w3=w3, b3=b3, w4=w4, b4=b4,
        g2=jnp.ones((u4,), jnp.float32), be2=jnp.zeros((u4,), jnp.float32),
    )


# ---------------------------------------------------------------------------
# Plain-JAX reference (unfolded, sequential, two-pass BN) for correctness check.
# ---------------------------------------------------------------------------
def _ref_branch(x, p, use_cos):
    act = jnp.cos if use_cos else (lambda v: jnp.maximum(v, 0.0))

    def bn(v):
        m = jnp.mean(v, axis=0, keepdims=True)
        var = jnp.mean((v - m) ** 2, axis=0, keepdims=True)
        return (v - m) / jnp.sqrt(var + _EPS)

    u2 = p["w1"].shape[0]
    h = x @ p["w1"].T + p["b1"]
    h = h @ p["w2"][:, :u2].T + p["b2"]
    h = act(bn(h) * p["g1"] + p["be1"])
    h = h @ p["w3"].T + p["b3"]
    h = h @ p["w4"].T + p["b4"]
    h = act(bn(h) * p["g2"] + p["be2"])
    return h


def reference_forward(x, spec_params, arc_params):
    return jnp.concatenate(
        [_ref_branch(x, spec_params, False), _ref_branch(x, arc_params, True)], axis=0
    )


if __name__ == "__main__":
    units = 32
    batch = 8

    key = jax.random.PRNGKey(0)
    kx, k_spec, k_arc = jax.random.split(key, 3)

    x = jax.random.normal(kx, (batch, units), jnp.float32)
    spec_params = init_branch_params(k_spec, units)
    arc_params = init_branch_params(k_arc, units)

    # One-time packing / folding (hoisted out of the per-forward path).
    packed = jax.tree_util.tree_map(
        jax.block_until_ready, pack_params(spec_params, arc_params)
    )

    out = dskn2_forward(x, packed)
    out = jax.block_until_ready(out)

    ref = reference_forward(x, spec_params, arc_params)
    assert out.shape == (2 * batch, units // 4), out.shape
    assert jnp.allclose(out, ref, atol=1e-4, rtol=1e-4), "mismatch vs JAX reference"

    print("KERNEL_OK")
</pallas_src>

<mosaic_0001>
module attributes {stable_mosaic.version = 11 : i64} {
  func.func @_dskn2_kernel(%arg0: memref<8x32xf32, #tpu.memory_space<vmem>>, %arg1: memref<2x32x16xf32, #tpu.memory_space<vmem>>, %arg2: memref<2x16x8xf32, #tpu.memory_space<vmem>>, %arg3: memref<2x8x16xf32, #tpu.memory_space<vmem>>, %arg4: memref<16x8xf32, #tpu.memory_space<vmem>>) attributes {dimension_semantics = [], scalar_prefetch = 0 : i64, scratch_operands = 0 : i64, tpu.core_type = #tpu.core_type<tc>} {
    %c0 = arith.constant 0 : index
    %c0_0 = arith.constant 0 : index
    %0 = vector.load %arg0[%c0, %c0_0] : memref<8x32xf32, #tpu.memory_space<vmem>>, vector<8x32xf32>
    %c0_1 = arith.constant 0 : index
    %c0_2 = arith.constant 0 : index
    %c0_3 = arith.constant 0 : index
    %1 = vector.load %arg3[%c0_1, %c0_2, %c0_3] : memref<2x8x16xf32, #tpu.memory_space<vmem>>, vector<1x8x16xf32>
    %2 = vector.shape_cast %1 : vector<1x8x16xf32> to vector<8x16xf32>
    %3 = vector.extract_strided_slice %2 {offsets = [0, 0], sizes = [1, 16], strides = [1, 1]} : vector<8x16xf32> to vector<1x16xf32>
    %4 = vector.extract_strided_slice %2 {offsets = [1, 0], sizes = [1, 16], strides = [1, 1]} : vector<8x16xf32> to vector<1x16xf32>
    %5 = vector.extract_strided_slice %2 {offsets = [2, 0], sizes = [1, 16], strides = [1, 1]} : vector<8x16xf32> to vector<1x16xf32>
    %6 = vector.extract_strided_slice %2 {offsets = [3, 0], sizes = [1, 8], strides = [1, 1]} : vector<8x16xf32> to vector<1x8xf32>
    %7 = vector.extract_strided_slice %2 {offsets = [4, 0], sizes = [1, 8], strides = [1, 1]} : vector<8x16xf32> to vector<1x8xf32>
    %8 = vector.extract_strided_slice %2 {offsets = [5, 0], sizes = [1, 8], strides = [1, 1]} : vector<8x16xf32> to vector<1x8xf32>
    %c0_4 = arith.constant 0 : index
    %c0_5 = arith.constant 0 : index
    %c0_6 = arith.constant 0 : index
    %9 = vector.load %arg1[%c0_4, %c0_5, %c0_6] : memref<2x32x16xf32, #tpu.memory_space<vmem>>, vector<1x32x16xf32>
    %10 = vector.shape_cast %9 : vector<1x32x16xf32> to vector<32x16xf32>
    %cst = arith.constant dense<0.000000e+00> : vector<8x16xf32>
    %11 = tpu.matmul %0, %10, %cst {dimension_numbers = #tpu.dot_dimension_numbers<[1], [0], [0], [1], [0, 0, 1, 1], [], []>} : vector<8x32xf32>, vector<32x16xf32>, vector<8x16xf32> -> vector<8x16xf32>
    %12 = vector.broadcast %3 : vector<1x16xf32> to vector<8x16xf32>
    %13 = arith.addf %11, %12 : vector<8x16xf32>
    %cst_7 = arith.constant dense<0.000000e+00> : vector<16xf32>
    %14 = vector.multi_reduction <add>, %13, %cst_7 [0] : vector<8x16xf32> to vector<16xf32>
    %15 = vector.shape_cast %14 : vector<16xf32> to vector<1x16xf32>
    %cst_8 = arith.constant 1.250000e-01 : f32
    %16 = vector.broadcast %cst_8 : f32 to vector<1x16xf32>
    %17 = arith.mulf %15, %16 : vector<1x16xf32>
    %18 = arith.mulf %13, %13 : vector<8x16xf32>
    %cst_9 = arith.constant dense<0.000000e+00> : vector<16xf32>
    %19 = vector.multi_reduction <add>, %18, %cst_9 [0] : vector<8x16xf32> to vector<16xf32>
    %20 = vector.shape_cast %19 : vector<16xf32> to vector<1x16xf32>
    %cst_10 = arith.constant 1.250000e-01 : f32
    %21 = vector.broadcast %cst_10 : f32 to vector<1x16xf32>
    %22 = arith.mulf %20, %21 : vector<1x16xf32>
    %23 = arith.mulf %17, %17 : vector<1x16xf32>
    %24 = arith.subf %22, %23 : vector<1x16xf32>
    %cst_11 = arith.constant 9.99999974E-6 : f32
    %25 = vector.broadcast %cst_11 : f32 to vector<1x16xf32>
    %26 = arith.addf %24, %25 : vector<1x16xf32>
    %27 = math.rsqrt %26 : vector<1x16xf32>
    %28 = arith.mulf %4, %27 : vector<1x16xf32>
    %29 = arith.mulf %17, %28 : vector<1x16xf32>
    %30 = arith.subf %5, %29 : vector<1x16xf32>
    %31 = vector.broadcast %28 : vector<1x16xf32> to vector<8x16xf32>
    %32 = arith.mulf %13, %31 : vector<8x16xf32>
    %33 = vector.broadcast %30 : vector<1x16xf32> to vector<8x16xf32>
    %34 = arith.addf %32, %33 : vector<8x16xf32>
    %cst_12 = arith.constant 0.000000e+00 : f32
    %35 = vector.broadcast %cst_12 : f32 to vector<8x16xf32>
    %36 = arith.maximumf %34, %35 : vector<8x16xf32>
    %c0_13 = arith.constant 0 : index
    %c0_14 = arith.constant 0 : index
    %c0_15 = arith.constant 0 : index
    %37 = vector.load %arg2[%c0_13, %c0_14, %c0_15] : memref<2x16x8xf32, #tpu.memory_space<vmem>>, vector<1x16x8xf32>
    %38 = vector.shape_cast %37 : vector<1x16x8xf32> to vector<16x8xf32>
    %cst_16 = arith.constant dense<0.000000e+00> : vector<8x8xf32>
    %39 = tpu.matmul %36, %38, %cst_16 {dimension_numbers = #tpu.dot_dimension_numbers<[1], [0], [0], [1], [0, 0, 1, 1], [], []>} : vector<8x16xf32>, vector<16x8xf32>, vector<8x8xf32> -> vector<8x8xf32>
    %40 = vector.broadcast %6 : vector<1x8xf32> to vector<8x8xf32>
    %41 = arith.addf %39, %40 : vector<8x8xf32>
    %cst_17 = arith.constant dense<0.000000e+00> : vector<8xf32>
    %42 = vector.multi_reduction <add>, %41, %cst_17 [0] : vector<8x8xf32> to vector<8xf32>
    %43 = vector.shape_cast %42 : vector<8xf32> to vector<1x8xf32>
    %cst_18 = arith.constant 1.250000e-01 : f32
    %44 = vector.broadcast %cst_18 : f32 to vector<1x8xf32>
    %45 = arith.mulf %43, %44 : vector<1x8xf32>
    %46 = arith.mulf %41, %41 : vector<8x8xf32>
    %cst_19 = arith.constant dense<0.000000e+00> : vector<8xf32>
    %47 = vector.multi_reduction <add>, %46, %cst_19 [0] : vector<8x8xf32> to vector<8xf32>
    %48 = vector.shape_cast %47 : vector<8xf32> to vector<1x8xf32>
    %cst_20 = arith.constant 1.250000e-01 : f32
    %49 = vector.broadcast %cst_20 : f32 to vector<1x8xf32>
    %50 = arith.mulf %48, %49 : vector<1x8xf32>
    %51 = arith.mulf %45, %45 : vector<1x8xf32>
    %52 = arith.subf %50, %51 : vector<1x8xf32>
    %cst_21 = arith.constant 9.99999974E-6 : f32
    %53 = vector.broadcast %cst_21 : f32 to vector<1x8xf32>
    %54 = arith.addf %52, %53 : vector<1x8xf32>
    %55 = math.rsqrt %54 : vector<1x8xf32>
    %56 = arith.mulf %7, %55 : vector<1x8xf32>
    %57 = arith.mulf %45, %56 : vector<1x8xf32>
    %58 = arith.subf %8, %57 : vector<1x8xf32>
    %59 = vector.broadcast %56 : vector<1x8xf32> to vector<8x8xf32>
    %60 = arith.mulf %41, %59 : vector<8x8xf32>
    %61 = vector.broadcast %58 : vector<1x8xf32> to vector<8x8xf32>
    %62 = arith.addf %60, %61 : vector<8x8xf32>
    %cst_22 = arith.constant 0.000000e+00 : f32
    %63 = vector.broadcast %cst_22 : f32 to vector<8x8xf32>
    %64 = arith.maximumf %62, %63 : vector<8x8xf32>
    %c0_23 = arith.constant 0 : index
    %c0_24 = arith.constant 0 : index
    %65 = vector.load %arg4[%c0_23, %c0_24] : memref<16x8xf32, #tpu.memory_space<vmem>>, vector<8x8xf32>
    tpu.vector_store %arg4[%c0_23, %c0_24], %64 {strides = array<i32>} : memref<16x8xf32, #tpu.memory_space<vmem>>, vector<8x8xf32>,
    %c1 = arith.constant 1 : index
    %c0_25 = arith.constant 0 : index
    %c0_26 = arith.constant 0 : index
    %66 = vector.load %arg3[%c1, %c0_25, %c0_26] : memref<2x8x16xf32, #tpu.memory_space<vmem>>, vector<1x8x16xf32>
    %67 = vector.shape_cast %66 : vector<1x8x16xf32> to vector<8x16xf32>
    %68 = vector.extract_strided_slice %67 {offsets = [0, 0], sizes = [1, 16], strides = [1, 1]} : vector<8x16xf32> to vector<1x16xf32>
    %69 = vector.extract_strided_slice %67 {offsets = [1, 0], sizes = [1, 16], strides = [1, 1]} : vector<8x16xf32> to vector<1x16xf32>
    %70 = vector.extract_strided_slice %67 {offsets = [2, 0], sizes = [1, 16], strides = [1, 1]} : vector<8x16xf32> to vector<1x16xf32>
    %71 = vector.extract_strided_slice %67 {offsets = [3, 0], sizes = [1, 8], strides = [1, 1]} : vector<8x16xf32> to vector<1x8xf32>
    %72 = vector.extract_strided_slice %67 {offsets = [4, 0], sizes = [1, 8], strides = [1, 1]} : vector<8x16xf32> to vector<1x8xf32>
    %73 = vector.extract_strided_slice %67 {offsets = [5, 0], sizes = [1, 8], strides = [1, 1]} : vector<8x16xf32> to vector<1x8xf32>
    %c1_27 = arith.constant 1 : index
    %c0_28 = arith.constant 0 : index
    %c0_29 = arith.constant 0 : index
    %74 = vector.load %arg1[%c1_27, %c0_28, %c0_29] : memref<2x32x16xf32, #tpu.memory_space<vmem>>, vector<1x32x16xf32>
    %75 = vector.shape_cast %74 : vector<1x32x16xf32> to vector<32x16xf32>
    %cst_30 = arith.constant dense<0.000000e+00> : vector<8x16xf32>
    %76 = tpu.matmul %0, %75, %cst_30 {dimension_numbers = #tpu.dot_dimension_numbers<[1], [0], [0], [1], [0, 0, 1, 1], [], []>} : vector<8x32xf32>, vector<32x16xf32>, vector<8x16xf32> -> vector<8x16xf32>
    %77 = vector.broadcast %68 : vector<1x16xf32> to vector<8x16xf32>
    %78 = arith.addf %76, %77 : vector<8x16xf32>
    %cst_31 = arith.constant dense<0.000000e+00> : vector<16xf32>
    %79 = vector.multi_reduction <add>, %78, %cst_31 [0] : vector<8x16xf32> to vector<16xf32>
    %80 = vector.shape_cast %79 : vector<16xf32> to vector<1x16xf32>
    %cst_32 = arith.constant 1.250000e-01 : f32
    %81 = vector.broadcast %cst_32 : f32 to vector<1x16xf32>
    %82 = arith.mulf %80, %81 : vector<1x16xf32>
    %83 = arith.mulf %78, %78 : vector<8x16xf32>
    %cst_33 = arith.constant dense<0.000000e+00> : vector<16xf32>
    %84 = vector.multi_reduction <add>, %83, %cst_33 [0] : vector<8x16xf32> to vector<16xf32>
    %85 = vector.shape_cast %84 : vector<16xf32> to vector<1x16xf32>
    %cst_34 = arith.constant 1.250000e-01 : f32
    %86 = vector.broadcast %cst_34 : f32 to vector<1x16xf32>
    %87 = arith.mulf %85, %86 : vector<1x16xf32>
    %88 = arith.mulf %82, %82 : vector<1x16xf32>
    %89 = arith.subf %87, %88 : vector<1x16xf32>
    %cst_35 = arith.constant 9.99999974E-6 : f32
    %90 = vector.broadcast %cst_35 : f32 to vector<1x16xf32>
    %91 = arith.addf %89, %90 : vector<1x16xf32>
    %92 = math.rsqrt %91 : vector<1x16xf32>
    %93 = arith.mulf %69, %92 : vector<1x16xf32>
    %94 = arith.mulf %82, %93 : vector<1x16xf32>
    %95 = arith.subf %70, %94 : vector<1x16xf32>
    %96 = vector.broadcast %93 : vector<1x16xf32> to vector<8x16xf32>
    %97 = arith.mulf %78, %96 : vector<8x16xf32>
    %98 = vector.broadcast %95 : vector<1x16xf32> to vector<8x16xf32>
    %99 = arith.addf %97, %98 : vector<8x16xf32>
    %100 = math.cos %99 : vector<8x16xf32>
    %c1_36 = arith.constant 1 : index
    %c0_37 = arith.constant 0 : index
    %c0_38 = arith.constant 0 : index
    %101 = vector.load %arg2[%c1_36, %c0_37, %c0_38] : memref<2x16x8xf32, #tpu.memory_space<vmem>>, vector<1x16x8xf32>
    %102 = vector.shape_cast %101 : vector<1x16x8xf32> to vector<16x8xf32>
    %cst_39 = arith.constant dense<0.000000e+00> : vector<8x8xf32>
    %103 = tpu.matmul %100, %102, %cst_39 {dimension_numbers = #tpu.dot_dimension_numbers<[1], [0], [0], [1], [0, 0, 1, 1], [], []>} : vector<8x16xf32>, vector<16x8xf32>, vector<8x8xf32> -> vector<8x8xf32>
    %104 = vector.broadcast %71 : vector<1x8xf32> to vector<8x8xf32>
    %105 = arith.addf %103, %104 : vector<8x8xf32>
    %cst_40 = arith.constant dense<0.000000e+00> : vector<8xf32>
    %106 = vector.multi_reduction <add>, %105, %cst_40 [0] : vector<8x8xf32> to vector<8xf32>
    %107 = vector.shape_cast %106 : vector<8xf32> to vector<1x8xf32>
    %cst_41 = arith.constant 1.250000e-01 : f32
    %108 = vector.broadcast %cst_41 : f32 to vector<1x8xf32>
    %109 = arith.mulf %107, %108 : vector<1x8xf32>
    %110 = arith.mulf %105, %105 : vector<8x8xf32>
    %cst_42 = arith.constant dense<0.000000e+00> : vector<8xf32>
    %111 = vector.multi_reduction <add>, %110, %cst_42 [0] : vector<8x8xf32> to vector<8xf32>
    %112 = vector.shape_cast %111 : vector<8xf32> to vector<1x8xf32>
    %cst_43 = arith.constant 1.250000e-01 : f32
    %113 = vector.broadcast %cst_43 : f32 to vector<1x8xf32>
    %114 = arith.mulf %112, %113 : vector<1x8xf32>
    %115 = arith.mulf %109, %109 : vector<1x8xf32>
    %116 = arith.subf %114, %115 : vector<1x8xf32>
    %cst_44 = arith.constant 9.99999974E-6 : f32
    %117 = vector.broadcast %cst_44 : f32 to vector<1x8xf32>
    %118 = arith.addf %116, %117 : vector<1x8xf32>
    %119 = math.rsqrt %118 : vector<1x8xf32>
    %120 = arith.mulf %72, %119 : vector<1x8xf32>
    %121 = arith.mulf %109, %120 : vector<1x8xf32>
    %122 = arith.subf %73, %121 : vector<1x8xf32>
    %123 = vector.broadcast %120 : vector<1x8xf32> to vector<8x8xf32>
    %124 = arith.mulf %105, %123 : vector<8x8xf32>
    %125 = vector.broadcast %122 : vector<1x8xf32> to vector<8x8xf32>
    %126 = arith.addf %124, %125 : vector<8x8xf32>
    %127 = math.cos %126 : vector<8x8xf32>
    %c8 = arith.constant 8 : index
    %c0_45 = arith.constant 0 : index
    %128 = vector.load %arg4[%c8, %c0_45] : memref<16x8xf32, #tpu.memory_space<vmem>>, vector<8x8xf32>
    tpu.vector_store %arg4[%c8, %c0_45], %127 {strides = array<i32>} : memref<16x8xf32, #tpu.memory_space<vmem>>, vector<8x8xf32>,
    return
  }
}

</mosaic_0001>

<bundles_post_ra>
// kernel: tpu_custom_call.1
= control target key start
LH: loop header
LB: loop body
LE: loop exit
PB: predicated region body
PF: predicated region fallthrough
CT: control target
= control target key end

     0   :  { %vm24_vm0 = vcmask 261120   ;;  %vm48_vm1 = vcmask 130048   ;;  %s912_s1 = inlined_call_operand.vmem [shape: f32[2,32,16], index: 1, kind: input, shape index: {}]   ;;  %s913_s0 = inlined_call_operand.vmem [shape: f32[8,32], index: 0, kind: input, shape index: {}]   ;;  %s914_s3 = inlined_call_operand.vmem [shape: f32[2,8,16], index: 3, kind: input, shape index: {}]   ;;  %s915_s2 = inlined_call_operand.vmem [shape: f32[2,16,8], index: 2, kind: input, shape index: {}]   ;;  %s916_s4 = inlined_call_operand.vmem [shape: f32[16,8], index: 4, kind: output, shape index: {}]  }
   0x1   :  { %v613_v0 = vld [vmem:[%s912_s1 + $0x38] sm:$0xff]  ;;  %v612_v1 = vld [vmem:[%s912_s1 + $0x30] sm:$0xff]  ;;  %v611_v3 = vld [vmem:[%s912_s1 + $0x28] sm:$0xff] }
   0x2   :  { %179 = vmatpush.msra.mxu2 %v613_v0  ;;  %v22_v2 = vld [vmem:[%s912_s1 + $0x18] sm:$0xff]  ;;  %v21_v4 = vld [vmem:[%s912_s1 + $0x10] sm:$0xff]  ;;  %v20_v5 = vld [vmem:[%s912_s1 + $0x8] sm:$0xff] }
   0x3   :  { %40 = vmatpush.msra.mxu0 %v22_v2  ;;  %v610_v6 = vld [vmem:[%s912_s1 + $0x20] sm:$0xff]  ;;  %v701_v9 = vld [vmem:[%s914_s3 + $0x8] sm:$0xff]  ;;  %v619_v61 = vld [vmem:[%s915_s2 + $0x18] sm:$0xff] }
   0x4   :  { %180 = vmatpush.msra.mxu2 %v612_v1  ;;  %v17_v7 = vld [vmem:[%s913_s0] sm:$0xff]  ;;  %v166_v10 = vperm.slane %v701_v9, 0  ;;  %v618_v62 = vld [vmem:[%s915_s2 + $0x10] sm:$0xff]  ;;  %402 = vmatpush.msra.mxu3 %v619_v61 }
   0x5   :  { %41 = vmatpush.msra.mxu0 %v21_v4  ;;  %v19_v8 = vld [vmem:[%s912_s1] sm:$0xff] }
   0x6   :  { %181 = vmatpush.msra.mxu2 %v611_v3  ;;  %v709_v36 = vld [vmem:[%s914_s3] sm:$0xff]  ;;  %403 = vmatpush.msra.mxu3 %v618_v62 }
   0x7   :  { %42 = vmatpush.msra.mxu0 %v20_v5  ;;  %v23_v39 = vperm.slane %v709_v36, 0 }
   0x8   :  { %182 = vmatpush.msra.mxu2 %v610_v6 }
   0x9   :  { %614 = vmatmul.msk.f32.vlgmr.msra.gmra.mxu2 %vm24_vm0, %v17_v7  ;;  %43 = vmatpush.msra.mxu0 %v19_v8 }
   0xa   :  { %607 = vmatmul.msk.f32.vlgmr.msra.gmra.mxu0 %vm24_vm0, %v17_v7 }
  0x87   :  { %v45_v37 = vpop.f32.mrf.mxu0 }
  0x88   :  { %v712_v41 = vadd.f32 %v45_v37, %v23_v39 }
  0x8a   :  { %v49_v43 = vsel %vm48_vm1, %v712_v41, 0.0  ;;  %v57_v44 = vmul.f32 %v712_v41, %v712_v41 }
  0x8b   :  { %v50_v45 = vrot.slane %v49_v43, 4 }
  0x8c   :  { %v184_v11 = vpop.f32.mrf.mxu2  ;;  %v58_v47 = vsel %vm48_vm1, %v57_v44, 0.0 }
  0x8d   :  { %v185_v12 = vadd.f32 %v184_v11, %v166_v10  ;;  %v51_v49 = vadd.f32 %v50_v45, %v49_v43  ;;  %v59_v50 = vrot.slane %v58_v47, 4 }
  0x8f   :  { %v187_v13 = vsel %vm48_vm1, %v185_v12, 0.0  ;;  %v195_v14 = vmul.f32 %v185_v12, %v185_v12  ;;  %v52_v54 = vrot.slane %v51_v49, 2  ;;  %v60_v55 = vadd.f32 %v59_v50, %v58_v47 }
  0x90   :  { %v188_v15 = vrot.slane %v187_v13, 4 }
  0x91   :  { %v196_v16 = vsel %vm48_vm1, %v195_v14, 0.0  ;;  %v53_v59 = vadd.f32 %v52_v54, %v51_v49  ;;  %v61_v60 = vrot.slane %v60_v55, 2 }
  0x92   :  { %v189_v17 = vadd.f32 %v188_v15, %v187_v13  ;;  %v197_v18 = vrot.slane %v196_v16, 4 }
  0x93   :  { %v54_v1 = vrot.slane %v53_v59, 1  ;;  %v62_v2 = vadd.f32 %v61_v60, %v60_v55 }
  0x94   :  { %v190_v19 = vrot.slane %v189_v17, 2  ;;  %v198_v20 = vadd.f32 %v197_v18, %v196_v16 }
  0x95   :  { %v55_v5 = vadd.f32 %v54_v1, %v53_v59  ;;  %v63_v6 = vrot.slane %v62_v2, 1 }
  0x96   :  { %v191_v21 = vadd.f32 %v190_v19, %v189_v17  ;;  %v199_v22 = vrot.slane %v198_v20, 2 }
  0x97   :  { %v731_v10 = vmul.f32 0.125, %v55_v5  ;;  %v64_v11 = vadd.f32 %v63_v6, %v62_v2 }
  0x98   :  { %v192_v23 = vrot.slane %v191_v21, 1  ;;  %v200_v24 = vadd.f32 %v199_v22, %v198_v20  ;;  %v639_v20 = vmov 683565275   ;;  %v640_v22 = vmov 2475754826  }
  0x99   :  { %v65_v16 = vmul.f32 0.125, %v64_v11  ;;  %v66_v17 = vmul.f32 %v731_v10, %v731_v10 }
  0x9a   :  { %v193_v25 = vadd.f32 %v192_v23, %v191_v21  ;;  %v201_v26 = vrot.slane %v200_v24, 1 }
  0x9b   :  { %v67_v45 = vsub.f32 %v65_v16, %v66_v17 }
  0x9c   :  { %v194_v27 = vmul.f32 0.125, %v193_v25  ;;  %v202_v28 = vadd.f32 %v201_v26, %v200_v24  ;;  %v641_v25 = vmov 2131351028  }
  0x9e   :  { %v203_v29 = vmul.f32 0.125, %v202_v28  ;;  %v204_v30 = vmul.f32 %v194_v27, %v194_v27  ;;  %v642_v28 = vmov 2102212464  }
  0xa0   :  { %v205_v31 = vsub.f32 %v203_v29, %v204_v30 }
  0xa2   :  { %v206_v32 = vadd.f32 1e-05, %v205_v31  ;;  %v643_v31 = vmov 920167782  }
  0xa4   :  { %631 = vrsqrt.f32 %v206_v32  ;;  %vm213_vm3 = vweird.f32 %v206_v32 }
  0xaa   :  { %v632_v33 = vpop.eup %631 }
  0xab   :  { %v208_v34 = vmul.f32 %v632_v33, %v206_v32  ;;  %vm214_vm2 = vweird.f32 %v632_v33 }
  0xac   :  { %vm215_vm4 = vmor %vm213_vm3, %vm214_vm2 }
  0xad   :  { %v209_v35 = vmul.f32 %v632_v33, %v208_v34  ;;  %v644_v34 = vmov 1326507024  }
  0xaf   :  { %v210_v38 = vmul.f32 0.5, %v209_v35 }
  0xb1   :  { %v211_v40 = vsub.f32 1.5, %v210_v38 }
  0xb3   :  { %v212_v42 = vmul.f32 %v632_v33, %v211_v40 }
  0xb5   :  { %v216_v46 = vsel %vm215_vm4, %v632_v33, %v212_v42 }
  0xb6   :  { %v217_v48 = vmul.f32 %v701_v9, %v216_v46 }
  0xb8   :  { %v218_v51 = vmul.f32 %v217_v48, %v194_v27  ;;  %v223_v53 = vperm.slane %v217_v48, 1 }
  0xba   :  { %v220_v52 = vrot.slane %v218_v51, 7  ;;  %v224_v57 = vmul.f32 %v223_v53, %v185_v12 }
  0xbc   :  { %v222_v56 = vsub.f32 %v701_v9, %v220_v52 }
  0xbe   :  { %v225_v58 = vperm.slane %v222_v56, 2 }
  0xc0   :  { %v727_v63 = vadd.f32 %v225_v58, %v224_v57  ;;  %v780_v57 = vadd.f32 1e-05, %v67_v45 }
  0xc2   :  { %v230_v0 = vand.u32 2139095040, %v727_v63  ;;  %v227_v7 = vand.u32 2147483647, %v727_v63  ;;  %633 = vrsqrt.f32 %v780_v57  ;;  %vm75_vm15 = vweird.f32 %v780_v57 }
  0xc4   :  { %v231_v3 = vshrl.u32 %v230_v0, 23  ;;  %v234_v13 = vand.u32 8388607, %v227_v7 }
  0xc6   :  { %v615_v4 = vadd.s32 4294967169, %v231_v3  ;;  %v235_v19 = vor.u32 8388608, %v234_v13  ;;  %v645_v13 = vmov 0  }
  0xc8   :  { %v237_v8 = vadd.s32 1, %v615_v4  ;;  %v757_v43 = vshll.u32 %v235_v19, 8 }
  0xca   :  { %vm238_vm5 = vcmp.gt.s32.totalorder %v237_v8, 0  ;;  %v276_v52 = vand.u32 65535, %v757_v43  ;;  %v277_v54 = vshrl.u32 %v757_v43, 16 }
  0xcb   :  { %v239_v12 = vsel %vm238_vm5, %v237_v8, 0  ;;  %vm229_vm5 = vcmp.lt.s32.totalorder %v727_v63, 0 }
  0xcc   :  { %v241_v14 = vand.u32 31, %v239_v12  ;;  %v739_v18 = vshrl.u32 %v239_v12, 5 }
  0xce   :  { %v735_v15 = vsub.s32 32, %v241_v14  ;;  %v244_v21 = vshll.u32 %v639_v20, %v241_v14  ;;  %v247_v23 = vshll.u32 %v640_v22, %v241_v14  ;;  %v250_v27 = vshll.u32 %v641_v25, %v241_v14 }
  0xcf   :  { %v253_v30 = vshll.u32 %v642_v28, %v241_v14  ;;  %v256_v33 = vshll.u32 %v643_v31, %v241_v14  ;;  %vm259_vm6 = vcmp.lt.s32.totalorder %v739_v18, 1  ;;  %vm262_vm7 = vcmp.lt.s32.totalorder %v739_v18, 4 }
  0xd0   :  { %v245_v24 = vshrl.u32 %v640_v22, %v735_v15  ;;  %v248_v26 = vshrl.u32 %v641_v25, %v735_v15  ;;  %v251_v29 = vshrl.u32 %v642_v28, %v735_v15  ;;  %v254_v32 = vshrl.u32 %v643_v31, %v735_v15 }
  0xd1   :  { %v257_v35 = vshrl.u32 %v644_v34, %v735_v15  ;;  %vm261_vm8 = vcmp.lt.s32.totalorder %v739_v18, 3  ;;  %vm260_vm9 = vcmp.lt.s32.totalorder %v739_v18, 2 }
  0xd2   :  { %v246_v37 = vor.u32 %v245_v24, %v244_v21  ;;  %v249_v38 = vor.u32 %v248_v26, %v247_v23  ;;  %v252_v39 = vor.u32 %v251_v29, %v250_v27  ;;  %v255_v40 = vor.u32 %v254_v32, %v253_v30  ;;  %v634_v29 = vpop.eup %633 }
  0xd3   :  { %v258_v42 = vor.u32 %v257_v35, %v256_v33  ;;  %v243_v24 = vshrl.u32 %v639_v20, %v735_v15  ;;  %v70_v15 = vmul.f32 %v634_v29, %v780_v57  ;;  %vm76_vm0 = vweird.f32 %v634_v29 }
  0xd4   :  { %v267_v44 = vsel %vm259_vm6, %v246_v37, %v249_v38  ;;  %v268_v46 = vsel %vm262_vm7, %v255_v40, 920167782  ;;  %v271_v47 = vsel %vm259_vm6, %v249_v38, %v252_v39  ;;  %v264_v21 = vsel %vm262_vm7, %v252_v39, 2102212464  ;;  %vm77_vm3 = vmor %vm75_vm15, %vm76_vm0 }
  0xd5   :  { %v269_v48 = vsel %vm261_vm8, %v252_v39, %v268_v46  ;;  %v272_v49 = vsel %vm262_vm7, %v258_v42, 1326507024  ;;  %v265_v39 = vsel %vm261_vm8, %v249_v38, %v264_v21  ;;  %v90_v21 = vld [vmem:[%s915_s2] sm:$0xff] }
  0xd6   :  { %v270_v50 = vsel %vm260_vm9, %v267_v44, %v269_v48  ;;  %v273_v51 = vsel %vm261_vm8, %v255_v40, %v272_v49  ;;  %v263_v40 = vsel %vm259_vm6, %v243_v24, %v246_v37  ;;  %v71_v37 = vmul.f32 %v634_v29, %v70_v15 }
  0xd7   :  { %v274_v53 = vsel %vm260_vm9, %v271_v47, %v273_v51  ;;  %v300_v55 = vand.u32 65535, %v270_v50  ;;  %v301_v56 = vshrl.u32 %v270_v50, 16  ;;  %v266_v47 = vsel %vm260_vm9, %v263_v40, %v265_v39 }
  0xd8   :  { %v278_v58 = vand.u32 65535, %v274_v53  ;;  %v279_v59 = vshrl.u32 %v274_v53, 16  ;;  %vm813_vm6 = vcmp.le.f32.partialorder %v227_v7, 0.7853982 }
  0xd9   :  { %v303_v60 = vmul.u32 %v301_v56, %v276_v52  ;;  %v304_v61 = vmul.u32 %v300_v55, %v277_v54  ;;  %v302_v1 = vmul.u32 %v300_v55, %v276_v52  ;;  %v305_v8 = vmul.u32 %v301_v56, %v277_v54 }
  0xda   :  { %v281_v62 = vmul.u32 %v279_v59, %v276_v52  ;;  %v282_v0 = vmul.u32 %v278_v58, %v277_v54  ;;  %v280_v3 = vmul.u32 %v278_v58, %v276_v52  ;;  %v283_v4 = vmul.u32 %v279_v59, %v277_v54 }
  0xdb   :  { %v306_v2 = vshll.u32 %v303_v60, 16  ;;  %v308_v11 = vshll.u32 %v304_v61, 16  ;;  %v307_v33 = vshrl.u32 %v303_v60, 16  ;;  %v309_v45 = vshrl.u32 %v304_v61, 16 }
  0xdc   :  { %v284_v5 = vshll.u32 %v281_v62, 16  ;;  %v286_v6 = vshll.u32 %v282_v0, 16  ;;  %v285_v30 = vshrl.u32 %v281_v62, 16  ;;  %v287_v42 = vshrl.u32 %v282_v0, 16 }
  0xdd   :  { %vm310_vm10 = vc.u32 %v302_v1, %v306_v2  ;;  %v312_v16 = vadd.s32 %v306_v2, %v302_v1  ;;  %v320_v52 = vmul.u32 %v757_v43, %v266_v47  ;;  %v72_v55 = vmul.f32 0.5, %v71_v37 }
  0xde   :  { %vm288_vm11 = vc.u32 %v280_v3, %v284_v5  ;;  %v290_v12 = vadd.s32 %v284_v5, %v280_v3  ;;  %v311_v14 = vsel %vm310_vm10, 1, %v645_v13  ;;  %vm370_vm10 = vweird.f32 %v727_v63 }
  0xdf   :  { %v289_v17 = vsel %vm288_vm11, 1, %v645_v13  ;;  %v313_v19 = vadd.s32 %v311_v14, %v305_v8  ;;  %vm314_vm13 = vc.u32 %v312_v16, %v308_v11  ;;  %v316_v49 = vadd.s32 %v312_v16, %v308_v11 }
  0xe0   :  { %v291_v23 = vadd.s32 %v289_v17, %v283_v4  ;;  %vm292_vm12 = vc.u32 %v290_v12, %v286_v6  ;;  %v315_v27 = vsel %vm314_vm13, 1, %v645_v13  ;;  %v73_v59 = vsub.f32 1.5, %v72_v55 }
  0xe1   :  { %v293_v26 = vsel %vm292_vm12, 1, %v645_v13  ;;  %v317_v35 = vadd.s32 %v315_v27, %v313_v19  ;;  %v91_v19 = vld [vmem:[%s915_s2 + $0x8] sm:$0xff]  ;;  %vm116_vm11 = vcmask 64512  }
  0xe2   :  { %v295_v32 = vadd.s32 %v293_v26, %v291_v23  ;;  %v74_v61 = vmul.f32 %v634_v29, %v73_v59  ;;  %110 = vmatpush.msra.mxu1 %v91_v19 }
  0xe3   :  { %v318_v46 = vadd.s32 %v317_v35, %v307_v33 }
  0xe4   :  { %v296_v44 = vadd.s32 %v295_v32, %v285_v30  ;;  %v78_v1 = vsel %vm77_vm3, %v634_v29, %v74_v61  ;;  %111 = vmatpush.msra.mxu1 %v90_v21 }
  0xe5   :  { %v319_v50 = vadd.s32 %v318_v46, %v309_v45  ;;  %v79_v2 = vmul.f32 %v78_v1, %v709_v36  ;;  %v92_v1 = vperm.slane %v709_v36, 3 }
  0xe6   :  { %v297_v48 = vadd.s32 %v296_v44, %v287_v42 }
  0xe7   :  { %v323_v51 = vadd.s32 1, %v319_v50  ;;  %v85_v57 = vperm.slane %v79_v2, 1  ;;  %v80_v14 = vmul.f32 %v79_v2, %v731_v10 }
  0xe8   :  { %vm322_vm14 = vc.u32 %v297_v48, %v316_v49  ;;  %v321_v4 = vadd.s32 %v316_v49, %v297_v48 }
  0xe9   :  { %v324_v53 = vsel %vm322_vm14, %v323_v51, %v319_v50  ;;  %v82_v23 = vrot.slane %v80_v14, 7  ;;  %v86_v26 = vmul.f32 %v85_v57, %v712_v41 }
  0xea   :  { %v325_v54 = vadd.s32 %v324_v53, %v320_v52 }
  0xeb   :  { %v84_v27 = vsub.f32 %v709_v36, %v82_v23 }
  0xec   :  { %v326_v38 = vadd.s32 536870912, %v325_v54 }
  0xed   :  { %v87_v10 = vperm.slane %v84_v27, 2 }
  0xee   :  { %v327_v56 = vshrl.u32 %v326_v38, 30 }
  0xef   :  { %v88_v33 = vadd.f32 %v87_v10, %v86_v26  ;;  %v384_v10 = vperm.slane %v701_v9, 3 }
  0xf0   :  { %v328_v58 = vshll.u32 %v327_v56, 30  ;;  %v351_v15 = vsub.s32 4, %v327_v56 }
  0xf1   :  { %v89_v40 = vmax.f32 %v88_v33, 0.0 }
  0xf2   :  { %v329_v60 = vsub.s32 %v325_v54, %v328_v58  ;;  %v352_v51 = vsel %vm229_vm5, %v351_v15, %v327_v56 }
  0xf3   :  { %608 = vmatmul.msk.f32.vlgmr.msra.gmra.mxu1 %vm48_vm1, %v89_v40  ;;  %v354_v37 = vsel %vm813_vm6, 0, %v352_v51 }
  0xf4   :  { %vm330_vm2 = vcmp.lt.s32.totalorder %v329_v60, 0  ;;  %v331_v18 = vsub.s32 0, %v329_v60  ;;  %v371_v58 = vand.u32 3, %v354_v37 }
  0xf6   :  { %v332_v62 = vsel %vm330_vm2, %v331_v18, %v329_v60  ;;  %vm373_vm7 = vcmp.eq.s32.totalorder %v371_v58, 0  ;;  %vm376_vm8 = vcmp.eq.s32.totalorder %v371_v58, 2  ;;  %vm372_vm9 = vcmp.lt.s32.totalorder %v371_v58, 2 }
  0xf7   :  { %v333_v0 = vclz %v332_v62 }
  0xf9   :  { %v616_v43 = vadd.s32 4294967294, %v333_v0 }
  0xfb   :  { %vm617_vm4 = vcmp.lt.s32.totalorder %v616_v43, 0 }
  0xfc   :  { %v336_v3 = vsel %vm617_vm4, 0, %v616_v43 }
  0xfd   :  { %v337_v5 = vsub.s32 32, %v336_v3  ;;  %v341_v6 = vsub.s32 4294967266, %v336_v3  ;;  %v338_v8 = vshll.u32 %v329_v60, %v336_v3 }
  0xff   :  { %v339_v11 = vshrl.u32 %v321_v4, %v337_v5  ;;  %v342_v12 = vadd.s32 127, %v341_v6 }
 0x101   :  { %v340_v16 = vor.u32 %v339_v11, %v338_v8  ;;  %v343_v17 = vshll.u32 %v342_v12, 23 }
 0x103   :  { %v344_v24 = vor.u32 4788187, %v343_v17  ;;  %v347_v30 = vcvt.s32.f32 %v340_v16 }
 0x105   :  { %v345_v29 = vand.u32 2147483647, %v344_v24 }
 0x107   :  { %v348_v32 = vmul.f32 %v347_v30, %v345_v29 }
 0x109   :  { %v349_v35 = vxor.u32 2147483648, %v348_v32 }
 0x10b   :  { %v350_v42 = vsel %vm229_vm5, %v349_v35, %v348_v32 }
 0x10c   :  { %v353_v41 = vsel %vm813_vm6, %v727_v63, %v350_v42 }
 0x10d   :  { %v355_v44 = vmul.f32 %v353_v41, %v353_v41 }
 0x10f   :  { %v356_v45 = vmul.f32 -0.001358992, %v355_v44  ;;  %v363_v46 = vmul.f32 -0.00019511016, %v355_v44 }
 0x111   :  { %v357_v47 = vadd.f32 0.041655596, %v356_v45  ;;  %v364_v48 = vadd.f32 0.008332121, %v363_v46 }
 0x113   :  { %v358_v49 = vmul.f32 %v357_v47, %v355_v44  ;;  %v365_v50 = vmul.f32 %v364_v48, %v355_v44 }
 0x115   :  { %v359_v7 = vadd.f32 -0.4999988, %v358_v49  ;;  %v366_v52 = vadd.f32 -0.16666654, %v365_v50 }
 0x117   :  { %v360_v53 = vmul.f32 %v359_v7, %v355_v44  ;;  %v367_v54 = vmul.f32 %v366_v52, %v355_v44 }
 0x119   :  { %v361_v38 = vadd.f32 1.0, %v360_v53  ;;  %v368_v55 = vadd.f32 1.0, %v367_v54 }
 0x11b   :  { %v369_v59 = vmul.f32 %v368_v55, %v353_v41  ;;  %v377_v60 = vxor.u32 2147483648, %v361_v38 }
 0x11d   :  { %v374_v18 = vxor.u32 2147483648, %v369_v59  ;;  %v378_v62 = vsel %vm376_vm8, %v377_v60, %v369_v59 }
 0x11f   :  { %v375_v61 = vsel %vm373_vm7, %v361_v38, %v374_v18 }
 0x120   :  { %v379_v56 = vsel %vm372_vm9, %v375_v61, %v378_v62 }
 0x121   :  { %v380_v0 = vsel %vm370_vm10, nan, %v379_v56 }
 0x122   :  { %620 = vmatmul.msk.f32.vlgmr.msra.gmra.mxu3 %vm48_vm1, %v380_v0 }
 0x170   :  { %v113_v43 = vpop.f32.mrf.mxu1 }
 0x171   :  { %v114_v2 = vadd.f32 %v113_v43, %v92_v1 }
 0x173   :  { %v117_v3 = vsel %vm116_vm11, %v114_v2, 0.0  ;;  %v125_v4 = vmul.f32 %v114_v2, %v114_v2 }
 0x174   :  { %v118_v5 = vrot.slane %v117_v3, 4 }
 0x175   :  { %v126_v6 = vsel %vm116_vm11, %v125_v4, 0.0 }
 0x176   :  { %v119_v8 = vadd.f32 %v118_v5, %v117_v3  ;;  %v127_v11 = vrot.slane %v126_v6, 4 }
 0x178   :  { %v120_v12 = vrot.slane %v119_v8, 2  ;;  %v128_v57 = vadd.f32 %v127_v11, %v126_v6 }
 0x17a   :  { %v121_v63 = vadd.f32 %v120_v12, %v119_v8  ;;  %v129_v14 = vrot.slane %v128_v57, 2 }
 0x17c   :  { %v122_v16 = vrot.slane %v121_v63, 1  ;;  %v130_v17 = vadd.f32 %v129_v14, %v128_v57 }
 0x17e   :  { %v123_v19 = vadd.f32 %v122_v16, %v121_v63  ;;  %v131_v21 = vrot.slane %v130_v17, 1 }
 0x180   :  { %v124_v23 = vmul.f32 0.125, %v123_v19  ;;  %v132_v24 = vadd.f32 %v131_v21, %v130_v17 }
 0x182   :  { %v133_v26 = vmul.f32 0.125, %v132_v24  ;;  %v134_v27 = vmul.f32 %v124_v23, %v124_v23 }
 0x184   :  { %v135_v29 = vsub.f32 %v133_v26, %v134_v27 }
 0x186   :  { %v136_v30 = vadd.f32 1e-05, %v135_v29 }
 0x188   :  { %635 = vrsqrt.f32 %v136_v30  ;;  %vm143_vm1 = vweird.f32 %v136_v30 }
 0x18e   :  { %v636_v35 = vpop.eup %635 }
 0x18f   :  { %v138_v40 = vmul.f32 %v636_v35, %v136_v30  ;;  %vm144_vm12 = vweird.f32 %v636_v35 }
 0x190   :  { %vm145_vm13 = vmor %vm143_vm1, %vm144_vm12 }
 0x191   :  { %v139_v44 = vmul.f32 %v636_v35, %v138_v40 }
 0x193   :  { %v140_v47 = vmul.f32 0.5, %v139_v44 }
 0x195   :  { %v141_v50 = vsub.f32 1.5, %v140_v47 }
 0x197   :  { %v142_v52 = vmul.f32 %v636_v35, %v141_v50 }
 0x199   :  { %v146_v54 = vsel %vm145_vm13, %v636_v35, %v142_v52 }
 0x19a   :  { %v147_v38 = vmul.f32 %v146_v54, %v709_v36 }
 0x19c   :  { %v148_v59 = vmul.f32 %v147_v38, %v124_v23  ;;  %v153_v60 = vperm.slane %v147_v38, 4 }
 0x19e   :  { %v150_v62 = vrot.slane %v148_v59, 7  ;;  %v154_v43 = vmul.f32 %v153_v60, %v114_v2 }
 0x1a0   :  { %v152_v1 = vsub.f32 %v709_v36, %v150_v62 }
 0x1a2   :  { %v155_v4 = vperm.slane %v152_v1, 5 }
 0x1a4   :  { %v156_v6 = vadd.f32 %v155_v4, %v154_v43 }
 0x1a5   :  { %v405_v32 = vpop.f32.mrf.mxu3 }
 0x1a6   :  { %v406_v33 = vadd.f32 %v405_v32, %v384_v10  ;;  %v157_v8 = vmax.f32 %v156_v6, 0.0 }
 0x1a8   :  { %v408_v39 = vsel %vm116_vm11, %v406_v33, 0.0  ;;  %v416_v42 = vmul.f32 %v406_v33, %v406_v33  ;;  %158 = vst.msk [vmem:[%s916_s4] sm:$0xff] %vm116_vm11, %v157_v8 }
 0x1a9   :  { %v409_v41 = vrot.slane %v408_v39, 4 }
 0x1aa   :  { %v417_v45 = vsel %vm116_vm11, %v416_v42, 0.0 }
 0x1ab   :  { %v410_v46 = vadd.f32 %v409_v41, %v408_v39  ;;  %v418_v15 = vrot.slane %v417_v45, 4 }
 0x1ad   :  { %v411_v48 = vrot.slane %v410_v46, 2  ;;  %v419_v49 = vadd.f32 %v418_v15, %v417_v45 }
 0x1af   :  { %v412_v51 = vadd.f32 %v411_v48, %v410_v46  ;;  %v420_v7 = vrot.slane %v419_v49, 2 }
 0x1b1   :  { %v413_v37 = vrot.slane %v412_v51, 1  ;;  %v421_v53 = vadd.f32 %v420_v7, %v419_v49 }
 0x1b3   :  { %v414_v55 = vadd.f32 %v413_v37, %v412_v51  ;;  %v422_v58 = vrot.slane %v421_v53, 1 }
 0x1b5   :  { %v415_v18 = vmul.f32 0.125, %v414_v55  ;;  %v423_v61 = vadd.f32 %v422_v58, %v421_v53 }
 0x1b7   :  { %v424_v56 = vmul.f32 0.125, %v423_v61  ;;  %v425_v0 = vmul.f32 %v415_v18, %v415_v18 }
 0x1b9   :  { %v426_v3 = vsub.f32 %v424_v56, %v425_v0 }
 0x1bb   :  { %v427_v5 = vadd.f32 1e-05, %v426_v3 }
 0x1bd   :  { %637 = vrsqrt.f32 %v427_v5  ;;  %vm434_vm15 = vweird.f32 %v427_v5 }
 0x1c3   :  { %v638_v11 = vpop.eup %637 }
 0x1c4   :  { %v429_v12 = vmul.f32 %v638_v11, %v427_v5  ;;  %vm435_vm14 = vweird.f32 %v638_v11 }
 0x1c5   :  { %vm436_vm0 = vmor %vm434_vm15, %vm435_vm14 }
 0x1c6   :  { %v430_v57 = vmul.f32 %v638_v11, %v429_v12 }
 0x1c8   :  { %v431_v63 = vmul.f32 0.5, %v430_v57 }
 0x1ca   :  { %v432_v14 = vsub.f32 1.5, %v431_v63 }
 0x1cc   :  { %v433_v16 = vmul.f32 %v638_v11, %v432_v14 }
 0x1ce   :  { %v437_v36 = vsel %vm436_vm0, %v638_v11, %v433_v16 }
 0x1cf   :  { %v438_v2 = vmul.f32 %v701_v9, %v437_v36 }
 0x1d1   :  { %v439_v17 = vmul.f32 %v438_v2, %v415_v18  ;;  %v444_v21 = vperm.slane %v438_v2, 4 }
 0x1d3   :  { %v441_v19 = vrot.slane %v439_v17, 7  ;;  %v445_v24 = vmul.f32 %v444_v21, %v406_v33 }
 0x1d5   :  { %v443_v23 = vsub.f32 %v701_v9, %v441_v19 }
 0x1d7   :  { %v446_v26 = vperm.slane %v443_v23, 5 }
 0x1d9   :  { %v839_v27 = vadd.f32 %v446_v26, %v445_v24 }
 0x1db   :  { %v451_v29 = vand.u32 2139095040, %v839_v27  ;;  %v448_v32 = vand.u32 2147483647, %v839_v27  ;;  %vm450_vm14 = vcmp.lt.s32.totalorder %v839_v27, 0 }
 0x1dd   :  { %v452_v30 = vshrl.u32 %v451_v29, 23  ;;  %v455_v40 = vand.u32 8388607, %v448_v32  ;;  %vm898_vm15 = vcmp.le.f32.partialorder %v448_v32, 0.7853982 }
 0x1df   :  { %v621_v10 = vadd.s32 4294967169, %v452_v30  ;;  %v456_v44 = vor.u32 8388608, %v455_v40 }
 0x1e1   :  { %v458_v35 = vadd.s32 1, %v621_v10 }
 0x1e3   :  { %vm459_vm2 = vcmp.gt.s32.totalorder %v458_v35, 0 }
 0x1e4   :  { %v460_v39 = vsel %vm459_vm2, %v458_v35, 0 }
 0x1e5   :  { %v462_v42 = vand.u32 31, %v460_v39  ;;  %v845_v9 = vshrl.u32 %v460_v39, 5 }
 0x1e7   :  { %v463_v41 = vsub.s32 32, %v462_v42  ;;  %v465_v33 = vshll.u32 %v639_v20, %v462_v42  ;;  %v468_v45 = vshll.u32 %v640_v22, %v462_v42  ;;  %v471_v47 = vshll.u32 %v641_v25, %v462_v42 }
 0x1e8   :  { %v474_v49 = vshll.u32 %v642_v28, %v462_v42  ;;  %v477_v51 = vshll.u32 %v643_v31, %v462_v42  ;;  %vm480_vm3 = vcmp.lt.s32.totalorder %v845_v9, 1  ;;  %vm483_vm4 = vcmp.lt.s32.totalorder %v845_v9, 4 }
 0x1e9   :  { %v466_v46 = vshrl.u32 %v640_v22, %v463_v41  ;;  %v469_v15 = vshrl.u32 %v641_v25, %v463_v41  ;;  %v472_v48 = vshrl.u32 %v642_v28, %v463_v41  ;;  %v475_v50 = vshrl.u32 %v643_v31, %v463_v41 }
 0x1ea   :  { %v478_v7 = vshrl.u32 %v644_v34, %v463_v41  ;;  %v858_v22 = vshll.u32 %v456_v44, 8  ;;  %vm482_vm5 = vcmp.lt.s32.totalorder %v845_v9, 3  ;;  %vm481_vm6 = vcmp.lt.s32.totalorder %v845_v9, 2 }
 0x1eb   :  { %v467_v52 = vor.u32 %v466_v46, %v465_v33  ;;  %v470_v37 = vor.u32 %v469_v15, %v468_v45  ;;  %v473_v53 = vor.u32 %v472_v48, %v471_v47  ;;  %v476_v54 = vor.u32 %v475_v50, %v474_v49 }
 0x1ec   :  { %v479_v38 = vor.u32 %v478_v7, %v477_v51  ;;  %v497_v18 = vand.u32 65535, %v858_v22  ;;  %v498_v61 = vshrl.u32 %v858_v22, 16  ;;  %v464_v29 = vshrl.u32 %v639_v20, %v463_v41 }
 0x1ed   :  { %v488_v25 = vsel %vm480_vm3, %v467_v52, %v470_v37  ;;  %v492_v28 = vsel %vm480_vm3, %v470_v37, %v473_v53  ;;  %v489_v31 = vsel %vm483_vm4, %v476_v54, 920167782  ;;  %v485_v23 = vsel %vm483_vm4, %v473_v53, 2102212464 }
 0x1ee   :  { %v493_v34 = vsel %vm483_vm4, %v479_v38, 1326507024  ;;  %v490_v55 = vsel %vm482_vm5, %v473_v53, %v489_v31  ;;  %v484_v42 = vsel %vm480_vm3, %v464_v29, %v467_v52  ;;  %v486_v44 = vsel %vm482_vm5, %v470_v37, %v485_v23 }
 0x1ef   :  { %v494_v58 = vsel %vm482_vm5, %v476_v54, %v493_v34  ;;  %v491_v59 = vsel %vm481_vm6, %v488_v25, %v490_v55  ;;  %v487_v20 = vsel %vm481_vm6, %v484_v42, %v486_v44  ;;  %vm591_vm4 = vweird.f32 %v839_v27 }
 0x1f0   :  { %v495_v60 = vsel %vm481_vm6, %v492_v28, %v494_v58  ;;  %v521_v0 = vand.u32 65535, %v491_v59  ;;  %v522_v1 = vshrl.u32 %v491_v59, 16  ;;  %v541_v49 = vmul.u32 %v858_v22, %v487_v20 }
 0x1f1   :  { %v499_v62 = vand.u32 65535, %v495_v60  ;;  %v500_v56 = vshrl.u32 %v495_v60, 16 }
 0x1f2   :  { %v524_v4 = vmul.u32 %v522_v1, %v497_v18  ;;  %v525_v5 = vmul.u32 %v521_v0, %v498_v61  ;;  %v523_v12 = vmul.u32 %v521_v0, %v497_v18  ;;  %v526_v16 = vmul.u32 %v522_v1, %v498_v61 }
 0x1f3   :  { %v502_v43 = vmul.u32 %v500_v56, %v497_v18  ;;  %v503_v3 = vmul.u32 %v499_v62, %v498_v61  ;;  %v501_v6 = vmul.u32 %v499_v62, %v497_v18  ;;  %v504_v11 = vmul.u32 %v500_v56, %v498_v61 }
 0x1f4   :  { %v527_v57 = vshll.u32 %v524_v4, 16  ;;  %v529_v2 = vshll.u32 %v525_v5, 16  ;;  %v528_v40 = vshrl.u32 %v524_v4, 16  ;;  %v530_v46 = vshrl.u32 %v525_v5, 16 }
 0x1f5   :  { %v505_v8 = vshll.u32 %v502_v43, 16  ;;  %v507_v63 = vshll.u32 %v503_v3, 16  ;;  %v506_v30 = vshrl.u32 %v502_v43, 16  ;;  %v508_v33 = vshrl.u32 %v503_v3, 16 }
 0x1f6   :  { %vm531_vm8 = vc.u32 %v523_v12, %v527_v57  ;;  %v533_v17 = vadd.s32 %v527_v57, %v523_v12 }
 0x1f7   :  { %vm509_vm7 = vc.u32 %v501_v6, %v505_v8  ;;  %v511_v14 = vadd.s32 %v505_v8, %v501_v6  ;;  %v532_v21 = vsel %vm531_vm8, 1, %v645_v13 }
 0x1f8   :  { %v510_v36 = vsel %vm509_vm7, 1, %v645_v13  ;;  %v534_v26 = vadd.s32 %v532_v21, %v526_v16  ;;  %vm535_vm10 = vc.u32 %v533_v17, %v529_v2  ;;  %v537_v48 = vadd.s32 %v533_v17, %v529_v2 }
 0x1f9   :  { %v512_v19 = vadd.s32 %v510_v36, %v504_v11  ;;  %vm513_vm9 = vc.u32 %v511_v14, %v507_v63  ;;  %v536_v35 = vsel %vm535_vm10, 1, %v645_v13 }
 0x1fa   :  { %v514_v24 = vsel %vm513_vm9, 1, %v645_v13  ;;  %v538_v39 = vadd.s32 %v536_v35, %v534_v26 }
 0x1fb   :  { %v516_v10 = vadd.s32 %v514_v24, %v512_v19 }
 0x1fc   :  { %v539_v15 = vadd.s32 %v538_v39, %v528_v40 }
 0x1fd   :  { %v517_v45 = vadd.s32 %v516_v10, %v506_v30 }
 0x1fe   :  { %v540_v41 = vadd.s32 %v539_v15, %v530_v46 }
 0x1ff   :  { %v518_v47 = vadd.s32 %v517_v45, %v508_v33 }
 0x200   :  { %v544_v13 = vadd.s32 1, %v540_v41 }
 0x201   :  { %vm543_vm1 = vc.u32 %v518_v47, %v537_v48  ;;  %v542_v9 = vadd.s32 %v537_v48, %v518_v47 }
 0x202   :  { %v545_v50 = vsel %vm543_vm1, %v544_v13, %v540_v41 }
 0x203   :  { %v546_v51 = vadd.s32 %v545_v50, %v541_v49 }
 0x205   :  { %v547_v7 = vadd.s32 536870912, %v546_v51 }
 0x207   :  { %v548_v52 = vshrl.u32 %v547_v7, 30 }
 0x209   :  { %v549_v53 = vshll.u32 %v548_v52, 30  ;;  %v572_v11 = vsub.s32 4, %v548_v52 }
 0x20b   :  { %v550_v37 = vsub.s32 %v546_v51, %v549_v53  ;;  %v573_v16 = vsel %vm450_vm14, %v572_v11, %v548_v52 }
 0x20c   :  { %v575_v32 = vsel %vm898_vm15, 0, %v573_v16 }
 0x20d   :  { %vm551_vm12 = vcmp.lt.s32.totalorder %v550_v37, 0  ;;  %v552_v54 = vsub.s32 0, %v550_v37  ;;  %v592_v24 = vand.u32 3, %v575_v32 }
 0x20f   :  { %v553_v38 = vsel %vm551_vm12, %v552_v54, %v550_v37  ;;  %vm594_vm0 = vcmp.eq.s32.totalorder %v592_v24, 0  ;;  %vm597_vm2 = vcmp.eq.s32.totalorder %v592_v24, 2  ;;  %vm593_vm3 = vcmp.lt.s32.totalorder %v592_v24, 2 }
 0x210   :  { %v554_v25 = vclz %v553_v38 }
 0x212   :  { %v622_v28 = vadd.s32 4294967294, %v554_v25 }
 0x214   :  { %vm623_vm13 = vcmp.lt.s32.totalorder %v622_v28, 0 }
 0x215   :  { %v557_v31 = vsel %vm623_vm13, 0, %v622_v28 }
 0x216   :  { %v558_v34 = vsub.s32 32, %v557_v31  ;;  %v562_v55 = vsub.s32 4294967266, %v557_v31  ;;  %v559_v58 = vshll.u32 %v550_v37, %v557_v31 }
 0x218   :  { %v560_v59 = vshrl.u32 %v542_v9, %v558_v34  ;;  %v563_v60 = vadd.s32 127, %v562_v55 }
 0x21a   :  { %v561_v22 = vor.u32 %v560_v59, %v559_v58  ;;  %v564_v18 = vshll.u32 %v563_v60, 23 }
 0x21c   :  { %v565_v61 = vor.u32 4788187, %v564_v18  ;;  %v568_v56 = vcvt.s32.f32 %v561_v22 }
 0x21e   :  { %v566_v62 = vand.u32 2147483647, %v565_v61 }
 0x220   :  { %v569_v0 = vmul.f32 %v568_v56, %v566_v62 }
 0x222   :  { %v570_v1 = vxor.u32 2147483648, %v569_v0 }
 0x224   :  { %v571_v3 = vsel %vm450_vm14, %v570_v1, %v569_v0 }
 0x225   :  { %v574_v4 = vsel %vm898_vm15, %v839_v27, %v571_v3 }
 0x226   :  { %v576_v5 = vmul.f32 %v574_v4, %v574_v4 }
 0x228   :  { %v577_v6 = vmul.f32 -0.001358992, %v576_v5  ;;  %v584_v8 = vmul.f32 -0.00019511016, %v576_v5 }
 0x22a   :  { %v578_v12 = vadd.f32 0.041655596, %v577_v6  ;;  %v585_v57 = vadd.f32 0.008332121, %v584_v8 }
 0x22c   :  { %v579_v63 = vmul.f32 %v578_v12, %v576_v5  ;;  %v586_v14 = vmul.f32 %v585_v57, %v576_v5 }
 0x22e   :  { %v580_v36 = vadd.f32 -0.4999988, %v579_v63  ;;  %v587_v2 = vadd.f32 -0.16666654, %v586_v14 }
 0x230   :  { %v581_v17 = vmul.f32 %v580_v36, %v576_v5  ;;  %v588_v19 = vmul.f32 %v587_v2, %v576_v5 }
 0x232   :  { %v582_v21 = vadd.f32 1.0, %v581_v17  ;;  %v589_v23 = vadd.f32 1.0, %v588_v19 }
 0x234   :  { %v590_v26 = vmul.f32 %v589_v23, %v574_v4  ;;  %v598_v29 = vxor.u32 2147483648, %v582_v21 }
 0x236   :  { %v595_v30 = vxor.u32 2147483648, %v590_v26  ;;  %v599_v35 = vsel %vm597_vm2, %v598_v29, %v590_v26 }
 0x238   :  { %v596_v10 = vsel %vm594_vm0, %v582_v21, %v595_v30 }
 0x239   :  { %v600_v40 = vsel %vm593_vm3, %v596_v10, %v599_v35 }
 0x23a   :  { %v601_v39 = vsel %vm591_vm4, nan, %v600_v40 }
 0x23b   :  { %602 = vst.msk [vmem:[%s916_s4 + $0x8] sm:$0xff] %vm116_vm11, %v601_v39 }

</bundles_post_ra>
